<compile_context>
chip_gen: v7x
topology: tpu7x:2x2x1
jax: 0.10.0
libtpu: 0.0.40
codegen_flags: <defaults>
</compile_context>

<pallas_src>
import jax
import jax.numpy as jnp
from jax.experimental import pallas as pl
from jax.experimental.pallas import tpu as pltpu

LANE = 128
SUBLANE = 8


def _silu(x):
    return x * jax.nn.sigmoid(x)


def _round_up(n, m):
    return ((n + m - 1) // m) * m


def _pick_tm(M, max_tm=512):
    """Largest multiple-of-8 divisor of M that is <= max_tm, preferring grid >= 2."""
    cands = [t for t in range(SUBLANE, min(M, max_tm) + 1, SUBLANE) if M % t == 0]
    if not cands:
        return M                       # tiny / odd M: single grid step
    two_step = [t for t in cands if M // t >= 2]
    return max(two_step) if two_step else max(cands)


def mamba_kernel(x_ref,
                 w1_ref, b1_ref, w2_ref, b2_ref,   # SelectiveSSM weights
                 w3_ref, b3_ref, w4_ref, b4_ref,   # MLP weights
                 o_ref):
    x = x_ref[...]                                                 # bf16 [tm, Dp]

    # --- SelectiveSSM: silu(x @ W1 + b1) @ W2 + b2 ---
    h = jnp.dot(x, w1_ref[...], preferred_element_type=jnp.float32) + b1_ref[...]
    h = _silu(h)                                                   # f32 [tm, Sp]
    y = jnp.dot(h.astype(jnp.bfloat16), w2_ref[...],
                preferred_element_type=jnp.float32) + b2_ref[...]  # f32 [tm, Dp]

    # --- MLP: silu(y @ W3 + b3) @ W4 + b4 ---
    g = jnp.dot(y.astype(jnp.bfloat16), w3_ref[...],
                preferred_element_type=jnp.float32) + b3_ref[...]
    g = _silu(g)                                                   # f32 [tm, Sp]
    z = jnp.dot(g.astype(jnp.bfloat16), w4_ref[...],
                preferred_element_type=jnp.float32) + b4_ref[...]  # f32 [tm, Dp]

    o_ref[...] = z.astype(o_ref.dtype)


def mamba_forward(x, params, *, max_tm=512):
    """x: [M, input_dim] float32.  params: dict of pre-transposed (in, out) weights."""
    M, D = x.shape
    S = params["w1"].shape[1]
    Dp, Sp = _round_up(D, LANE), _round_up(S, LANE)

    # Pad the row count to a sublane multiple so any batch*seq works, then pick tm.
    Mp = _round_up(M, SUBLANE)
    tm = _pick_tm(Mp, max_tm)
    Mp = _round_up(Mp, tm)
    grid = Mp // tm

    # ---- layout plumbing: zero-pad to lane-dense 128-multiples and cast matmul
    # operands to bf16 (accumulation stays f32 inside the kernel).
    xp = jnp.pad(x, ((0, Mp - M), (0, Dp - D))).astype(jnp.bfloat16)

    def pad_w(w):
        fi, fo = w.shape
        return jnp.pad(
            w, ((0, _round_up(fi, LANE) - fi), (0, _round_up(fo, LANE) - fo))
        ).astype(jnp.bfloat16)

    def pad_b(b):
        fo = b.shape[1]
        return jnp.pad(b, ((0, 0), (0, _round_up(fo, LANE) - fo)))   # stays f32

    w1, b1 = pad_w(params["w1"]), pad_b(params["b1"])
    w2, b2 = pad_w(params["w2"]), pad_b(params["b2"])
    w3, b3 = pad_w(params["w3"]), pad_b(params["b3"])
    w4, b4 = pad_w(params["w4"]), pad_b(params["b4"])

    row_spec = pl.BlockSpec((tm, Dp), lambda i: (i, 0))
    full = lambda shape: pl.BlockSpec(shape, lambda i: (0, 0))

    flops = 8 * Mp * Dp * Sp                 # 4 GEMMs, 2*M*D*S each
    transcendentals = 2 * Mp * Sp            # two SiLU sigmoids
    bytes_accessed = (
        xp.size * 2
        + (w1.size + w2.size + w3.size + w4.size) * 2
        + (b1.size + b2.size + b3.size + b4.size) * 4
        + Mp * Dp * 4
    )

    out = pl.pallas_call(
        mamba_kernel,
        out_shape=jax.ShapeDtypeStruct((Mp, Dp), jnp.float32),
        grid_spec=pl.GridSpec(
            grid=(grid,),
            in_specs=[
                row_spec,                        # x tile (bf16, lane-dense)
                full((Dp, Sp)), full((1, Sp)),   # w1, b1  (in -> state)
                full((Sp, Dp)), full((1, Dp)),   # w2, b2  (state -> in)
                full((Dp, Sp)), full((1, Sp)),   # w3, b3  (in -> state)
                full((Sp, Dp)), full((1, Dp)),   # w4, b4  (state -> in)
            ],
            out_specs=row_spec,
        ),
        compiler_params=pltpu.CompilerParams(
            dimension_semantics=("parallel",)),
        cost_estimate=pl.CostEstimate(
            flops=flops,
            transcendentals=transcendentals,
            bytes_accessed=bytes_accessed),
    )(xp, w1, b1, w2, b2, w3, b3, w4, b4)

    # Drop padded rows / lanes; padded columns are exactly zero by construction.
    return out[:M, :D].astype(x.dtype)


def init_params(key, input_dim, state_dim):
    """Deterministic init mirroring nn.Linear shapes (stored transposed: (in, out))."""
    ks = jax.random.split(key, 8)

    def lin(kw, kb, fan_in, fan_out):
        bound = 1.0 / jnp.sqrt(fan_in)
        # PyTorch Linear weight is (out, in); store its transpose (in, out).
        w = jax.random.uniform(kw, (fan_in, fan_out), jnp.float32, -bound, bound)
        b = jax.random.uniform(kb, (1, fan_out), jnp.float32, -bound, bound)
        return w, b

    w1, b1 = lin(ks[0], ks[1], input_dim, state_dim)   # ssm.linear1
    w2, b2 = lin(ks[2], ks[3], state_dim, input_dim)   # ssm.linear2
    w3, b3 = lin(ks[4], ks[5], input_dim, state_dim)   # mlp[0]
    w4, b4 = lin(ks[6], ks[7], state_dim, input_dim)   # mlp[2]
    return dict(w1=w1, b1=b1, w2=w2, b2=b2, w3=w3, b3=b3, w4=w4, b4=b4)


def mamba_ref(x, p):
    h = _silu(x @ p["w1"] + p["b1"])
    y = h @ p["w2"] + p["b2"]
    g = _silu(y @ p["w3"] + p["b3"])
    return g @ p["w4"] + p["b4"]


if __name__ == "__main__":
    key = jax.random.PRNGKey(0)
    k_x, k_p = jax.random.split(key)

    batch, seq, input_dim, state_dim = 8, 16, 32, 64
    x = jax.random.normal(k_x, (batch, seq, input_dim), jnp.float32)
    params = init_params(k_p, input_dim, state_dim)

    x2d = x.reshape(batch * seq, input_dim)        # [128, 32] rows
    out = mamba_forward(x2d, params)               # tm=64 -> grid=(2,)
    out = jax.block_until_ready(out).reshape(batch, seq, input_dim)

    ref = mamba_ref(x2d, params).reshape(batch, seq, input_dim)
    # bf16 matmul operands (f32 accumulation) vs. a pure-f32 reference.
    assert jnp.allclose(out, ref, atol=3e-2, rtol=3e-2), "mismatch vs reference"

    print("KERNEL_OK")
</pallas_src>

<mosaic_0001>
module attributes {stable_mosaic.version = 11 : i64} {
  func.func @mamba_kernel(%arg0: i32, %arg1: memref<64x128xbf16, #tpu.memory_space<vmem>>, %arg2: memref<128x128xbf16, #tpu.memory_space<vmem>>, %arg3: memref<1x128xf32, #tpu.memory_space<vmem>>, %arg4: memref<128x128xbf16, #tpu.memory_space<vmem>>, %arg5: memref<1x128xf32, #tpu.memory_space<vmem>>, %arg6: memref<128x128xbf16, #tpu.memory_space<vmem>>, %arg7: memref<1x128xf32, #tpu.memory_space<vmem>>, %arg8: memref<128x128xbf16, #tpu.memory_space<vmem>>, %arg9: memref<1x128xf32, #tpu.memory_space<vmem>>, %arg10: memref<64x128xf32, #tpu.memory_space<vmem>>) attributes {dimension_semantics = [#tpu.dimension_semantics<parallel>], iteration_bounds = array<i64: 2>, scalar_prefetch = 0 : i64, scratch_operands = 0 : i64, tpu.core_type = #tpu.core_type<tc>, window_params = [{transform_indices = @transform_0, window_bounds = array<i64: 64, 128>}, {pipeline_mode = #tpu.pipeline_mode<synchronous>, transform_indices = @transform_1, window_bounds = array<i64: 128, 128>}, {pipeline_mode = #tpu.pipeline_mode<synchronous>, transform_indices = @transform_2, window_bounds = array<i64: 1, 128>}, {pipeline_mode = #tpu.pipeline_mode<synchronous>, transform_indices = @transform_3, window_bounds = array<i64: 128, 128>}, {pipeline_mode = #tpu.pipeline_mode<synchronous>, transform_indices = @transform_4, window_bounds = array<i64: 1, 128>}, {pipeline_mode = #tpu.pipeline_mode<synchronous>, transform_indices = @transform_5, window_bounds = array<i64: 128, 128>}, {pipeline_mode = #tpu.pipeline_mode<synchronous>, transform_indices = @transform_6, window_bounds = array<i64: 1, 128>}, {pipeline_mode = #tpu.pipeline_mode<synchronous>, transform_indices = @transform_7, window_bounds = array<i64: 128, 128>}, {pipeline_mode = #tpu.pipeline_mode<synchronous>, transform_indices = @transform_8, window_bounds = array<i64: 1, 128>}, {transform_indices = @transform_9, window_bounds = array<i64: 64, 128>}]} {
    %c0 = arith.constant 0 : index
    %c0_0 = arith.constant 0 : index
    %0 = vector.load %arg1[%c0, %c0_0] : memref<64x128xbf16, #tpu.memory_space<vmem>>, vector<64x128xbf16>
    %c0_1 = arith.constant 0 : index
    %c0_2 = arith.constant 0 : index
    %1 = vector.load %arg2[%c0_1, %c0_2] : memref<128x128xbf16, #tpu.memory_space<vmem>>, vector<128x128xbf16>
    %cst = arith.constant dense<0.000000e+00> : vector<64x128xf32>
    %2 = tpu.matmul %0, %1, %cst {dimension_numbers = #tpu.dot_dimension_numbers<[1], [0], [0], [1], [0, 0, 1, 1], [], []>} : vector<64x128xbf16>, vector<128x128xbf16>, vector<64x128xf32> -> vector<64x128xf32>
    %c0_3 = arith.constant 0 : index
    %c0_4 = arith.constant 0 : index
    %3 = vector.load %arg3[%c0_3, %c0_4] : memref<1x128xf32, #tpu.memory_space<vmem>>, vector<1x128xf32>
    %4 = vector.broadcast %3 : vector<1x128xf32> to vector<64x128xf32>
    %5 = arith.addf %2, %4 : vector<64x128xf32>
    %6 = arith.negf %5 : vector<64x128xf32>
    %7 = math.exp %6 : vector<64x128xf32>
    %cst_5 = arith.constant 1.000000e+00 : f32
    %8 = vector.broadcast %cst_5 : f32 to vector<64x128xf32>
    %9 = arith.addf %8, %7 : vector<64x128xf32>
    %10 = arith.divf %8, %9 : vector<64x128xf32>
    %11 = arith.mulf %5, %10 : vector<64x128xf32>
    %12 = arith.truncf %11 : vector<64x128xf32> to vector<64x128xbf16>
    %c0_6 = arith.constant 0 : index
    %c0_7 = arith.constant 0 : index
    %13 = vector.load %arg4[%c0_6, %c0_7] : memref<128x128xbf16, #tpu.memory_space<vmem>>, vector<128x128xbf16>
    %cst_8 = arith.constant dense<0.000000e+00> : vector<64x128xf32>
    %14 = tpu.matmul %12, %13, %cst_8 {dimension_numbers = #tpu.dot_dimension_numbers<[1], [0], [0], [1], [0, 0, 1, 1], [], []>} : vector<64x128xbf16>, vector<128x128xbf16>, vector<64x128xf32> -> vector<64x128xf32>
    %c0_9 = arith.constant 0 : index
    %c0_10 = arith.constant 0 : index
    %15 = vector.load %arg5[%c0_9, %c0_10] : memref<1x128xf32, #tpu.memory_space<vmem>>, vector<1x128xf32>
    %16 = vector.broadcast %15 : vector<1x128xf32> to vector<64x128xf32>
    %17 = arith.addf %14, %16 : vector<64x128xf32>
    %18 = arith.truncf %17 : vector<64x128xf32> to vector<64x128xbf16>
    %c0_11 = arith.constant 0 : index
    %c0_12 = arith.constant 0 : index
    %19 = vector.load %arg6[%c0_11, %c0_12] : memref<128x128xbf16, #tpu.memory_space<vmem>>, vector<128x128xbf16>
    %cst_13 = arith.constant dense<0.000000e+00> : vector<64x128xf32>
    %20 = tpu.matmul %18, %19, %cst_13 {dimension_numbers = #tpu.dot_dimension_numbers<[1], [0], [0], [1], [0, 0, 1, 1], [], []>} : vector<64x128xbf16>, vector<128x128xbf16>, vector<64x128xf32> -> vector<64x128xf32>
    %c0_14 = arith.constant 0 : index
    %c0_15 = arith.constant 0 : index
    %21 = vector.load %arg7[%c0_14, %c0_15] : memref<1x128xf32, #tpu.memory_space<vmem>>, vector<1x128xf32>
    %22 = vector.broadcast %21 : vector<1x128xf32> to vector<64x128xf32>
    %23 = arith.addf %20, %22 : vector<64x128xf32>
    %24 = arith.negf %23 : vector<64x128xf32>
    %25 = math.exp %24 : vector<64x128xf32>
    %cst_16 = arith.constant 1.000000e+00 : f32
    %26 = vector.broadcast %cst_16 : f32 to vector<64x128xf32>
    %27 = arith.addf %26, %25 : vector<64x128xf32>
    %28 = arith.divf %26, %27 : vector<64x128xf32>
    %29 = arith.mulf %23, %28 : vector<64x128xf32>
    %30 = arith.truncf %29 : vector<64x128xf32> to vector<64x128xbf16>
    %c0_17 = arith.constant 0 : index
    %c0_18 = arith.constant 0 : index
    %31 = vector.load %arg8[%c0_17, %c0_18] : memref<128x128xbf16, #tpu.memory_space<vmem>>, vector<128x128xbf16>
    %cst_19 = arith.constant dense<0.000000e+00> : vector<64x128xf32>
    %32 = tpu.matmul %30, %31, %cst_19 {dimension_numbers = #tpu.dot_dimension_numbers<[1], [0], [0], [1], [0, 0, 1, 1], [], []>} : vector<64x128xbf16>, vector<128x128xbf16>, vector<64x128xf32> -> vector<64x128xf32>
    %c0_20 = arith.constant 0 : index
    %c0_21 = arith.constant 0 : index
    %33 = vector.load %arg9[%c0_20, %c0_21] : memref<1x128xf32, #tpu.memory_space<vmem>>, vector<1x128xf32>
    %34 = vector.broadcast %33 : vector<1x128xf32> to vector<64x128xf32>
    %35 = arith.addf %32, %34 : vector<64x128xf32>
    %c0_22 = arith.constant 0 : index
    %c0_23 = arith.constant 0 : index
    %36 = vector.load %arg10[%c0_22, %c0_23] : memref<64x128xf32, #tpu.memory_space<vmem>>, vector<64x128xf32>
    tpu.vector_store %arg10[%c0_22, %c0_23], %35 {strides = array<i32>} : memref<64x128xf32, #tpu.memory_space<vmem>>, vector<64x128xf32>,
    return
  }
  func.func @transform_0(%arg0: i32) -> (i32, i32) {
    %c0_i32 = arith.constant 0 : i32
    %c0_i32_0 = arith.constant 0 : i32
    return %arg0, %c0_i32 : i32, i32
  }
  func.func @transform_1(%arg0: i32) -> (i32, i32) {
    %c0_i32 = arith.constant 0 : i32
    %c0_i32_0 = arith.constant 0 : i32
    %c0_i32_1 = arith.constant 0 : i32
    return %c0_i32, %c0_i32_0 : i32, i32
  }
  func.func @transform_2(%arg0: i32) -> (i32, i32) {
    %c0_i32 = arith.constant 0 : i32
    %c0_i32_0 = arith.constant 0 : i32
    %c0_i32_1 = arith.constant 0 : i32
    return %c0_i32, %c0_i32_0 : i32, i32
  }
  func.func @transform_3(%arg0: i32) -> (i32, i32) {
    %c0_i32 = arith.constant 0 : i32
    %c0_i32_0 = arith.constant 0 : i32
    %c0_i32_1 = arith.constant 0 : i32
    return %c0_i32, %c0_i32_0 : i32, i32
  }
  func.func @transform_4(%arg0: i32) -> (i32, i32) {
    %c0_i32 = arith.constant 0 : i32
    %c0_i32_0 = arith.constant 0 : i32
    %c0_i32_1 = arith.constant 0 : i32
    return %c0_i32, %c0_i32_0 : i32, i32
  }
  func.func @transform_5(%arg0: i32) -> (i32, i32) {
    %c0_i32 = arith.constant 0 : i32
    %c0_i32_0 = arith.constant 0 : i32
    %c0_i32_1 = arith.constant 0 : i32
    return %c0_i32, %c0_i32_0 : i32, i32
  }
  func.func @transform_6(%arg0: i32) -> (i32, i32) {
    %c0_i32 = arith.constant 0 : i32
    %c0_i32_0 = arith.constant 0 : i32
    %c0_i32_1 = arith.constant 0 : i32
    return %c0_i32, %c0_i32_0 : i32, i32
  }
  func.func @transform_7(%arg0: i32) -> (i32, i32) {
    %c0_i32 = arith.constant 0 : i32
    %c0_i32_0 = arith.constant 0 : i32
    %c0_i32_1 = arith.constant 0 : i32
    return %c0_i32, %c0_i32_0 : i32, i32
  }
  func.func @transform_8(%arg0: i32) -> (i32, i32) {
    %c0_i32 = arith.constant 0 : i32
    %c0_i32_0 = arith.constant 0 : i32
    %c0_i32_1 = arith.constant 0 : i32
    return %c0_i32, %c0_i32_0 : i32, i32
  }
  func.func @transform_9(%arg0: i32) -> (i32, i32) {
    %c0_i32 = arith.constant 0 : i32
    %c0_i32_0 = arith.constant 0 : i32
    return %arg0, %c0_i32 : i32, i32
  }
}

</mosaic_0001>

<bundles_post_ra>
// kernel: tpu_custom_call.1
= control target key start
LH: loop header
LB: loop body
LE: loop exit
PB: predicated region body
PF: predicated region fallthrough
CT: control target
= control target key end

     0   :  { %s2249_s0 = inlined_call_operand.hbm [shape: bf16[128,128], index: 0, kind: input, shape index: {}]   ;;  %s2250_s1 = inlined_call_operand.hbm [shape: bf16[128,128], index: 1, kind: input, shape index: {}]   ;;  %s2251_s2 = inlined_call_operand.vmem [shape: f32[1,128], index: 2, kind: input, shape index: {}]   ;;  %s2252_s3 = inlined_call_operand.hbm [shape: bf16[128,128], index: 3, kind: input, shape index: {}]   ;;  %s2253_s4 = inlined_call_operand.vmem [shape: f32[1,128], index: 4, kind: input, shape index: {}]   ;;  %s2254_s5 = inlined_call_operand.hbm [shape: bf16[128,128], index: 5, kind: input, shape index: {}]   ;;  %s2255_s6 = inlined_call_operand.vmem [shape: f32[1,128], index: 6, kind: input, shape index: {}]   ;;  %s2256_s7 = inlined_call_operand.hbm [shape: bf16[128,128], index: 7, kind: input, shape index: {}]   ;;  %s2257_s8 = inlined_call_operand.vmem [shape: f32[1,128], index: 8, kind: input, shape index: {}]   ;;  %s2258_s9 = inlined_call_operand.hbm [shape: f32[128,128], index: 9, kind: output, shape index: {}]  }
   0x1   :  { %2265 = sst [smem:[#allocation18_spill]] %s2258_s9 }
   0x2   :  { %14 = vsyncpa [#allocation3], 0 }
   0x3   :  { %16 = vsyncpa [#allocation3 + $0x1], 0 }
   0x4   :  { %17 = vsyncpa [#allocation6], 0 }
   0x5   :  { %18 = vsyncpa [#allocation9], 0 }
   0x6   :  { %19 = vsyncpa [#allocation4], 0 }
   0x7   :  { %21 = vsyncpa [#allocation4 + $0x1], 0  ;;  %s1938_s30 = smov 0   ;;  %s1940_s10 = smov 0  }
   0x8   :  { %s1942_s11 = smov 0   ;;  %s1944_s12 = smov 0  }
   0x9 LB: > { %2266 = sst [smem:[#allocation16_spill]] %s1864_s30  ;;  %s1959_s13 = sadd.s32 4294967295, %s1876_s12   ;;  %s1876_s12 = sphi %s1944_s12, %s2290_s12   ;;  %s1872_s11 = sphi %s1942_s11, %s2289_s11   ;;  %s1868_s10 = sphi %s1940_s10, %s2288_s10   ;;  %s1864_s30 = sphi %s1938_s30, %s2287_s30  }
   0xa   : > { %s1245_s14 = sadd.s32 4294967294, %s1876_s12   ;;  %p47_p0 = scmp.ne.s32.totalorder %s1868_s10, %s1864_s30 }
   0xb   : > { %p2259_p1 = scmp.eq.s32.totalorder %s1959_s13, 0  ;;  %p245_p3 = scmp.eq.s32.totalorder %s1245_s14, 1 }
   0xc   : > { %p1246_p5 = scmp.ge.s32.totalorder %s1876_s12, 1  ;;  %p252_p7 = scmp.lt.s32.totalorder %s1876_s12, 3 }
   0xd   : > { %p1968_p4 = por %p2259_p1, %p47_p0  ;;  %p1973_p6 = por %p245_p3, %p47_p0 }
   0xe   : > { %p1978_p8 = pnand %p1246_p5, %p252_p7  ;;  %s1878_s18 = smov [#allocation5]  }
   0xf   : > { %s2267_s15 = scalar_select %p1968_p4, 1, 0 }
  0x10   : > { %s2268_s16 = scalar_select %p1973_p6, 1, 0 }
  0x11   : > { %s2270_s17 = scalar_select %p1978_p8, 1, 0 }
  0x12   : > { %2269 = sst [smem:[#allocation17_spill]] %s2268_s16  ;;  %s264_s19 = sshll.u32 %s1878_s18, 4  ;;  %s1982_s19 = int_to_ptr.vmem [resolvable:$true] %s264_s19 }
  0x13   : > { %p1489_p9 = pneg %p1978_p8  ;;  %s1879_s21 = smov [#allocation8]  }
  0x14   : > { %s296_s22 = sshll.u32 %s1879_s21, 4  ;;  %s1880_s23 = smov [#allocation7]   ;;  %s1993_s22 = int_to_ptr.vmem [resolvable:$true] %s296_s22 }
  0x15   : > { %p1989_p11 = pnand %p1489_p9, %p2259_p1  ;;  %s1995_s24 = sshll.u32 %s1880_s23, 4  ;;  %s281_s24 = int_to_ptr.vmem [resolvable:$true] %s1995_s24 }
  0x16   : > { %s1660_s27 = scalar_lea.hbm %s2250_s1, 1024 }
  0x17   : > { %p1661_p12 = scmp.ne.s32.totalorder %s2250_s1, %s1660_s27  ;;  %p2005_p13 = pneg %p1989_p11 }
  0x18   : > { %p1667_p5 = scmp.lt.u32.totalorder %s1660_s27, %s2250_s1 }
  0x19   : > { %p1663_p0 = pnand %p2005_p13, %p1661_p12 }
  0x1b   : > { %p1664_p3 = pneg %p1663_p0 }
  0x1d   : > { %p1669_p7 = pnand %p1667_p5, %p1664_p3 }
  0x1f   : > { %1672 = shalt.err (!%p1669_p7)
}
  0x20   : > { %s1673_s23 = scalar_lea.vmem %s1982_s19, 1024  ;;  %p1681_p2 = scmp.lt.s32.totalorder %s1982_s19, %s1982_s19 }
  0x21   : > { %p1674_p9 = scmp.ne.s32.totalorder %s1982_s19, %s1673_s23  ;;  %p1682_p6 = scmp.lt.s32.totalorder %s1673_s23, %s1673_s23 }
  0x23   : > { %p1676_p10 = pnand %p1674_p9, %p2005_p13  ;;  %p1683_p12 = por %p1682_p6, %p1681_p2 }
  0x25   : > { %p1677_p1 = pneg %p1676_p10 }
  0x27   : > { %p1684_p0 = pnand %p1683_p12, %p1677_p1 }
  0x29   : > { %1687 = shalt.err (!%p1684_p0)
}
  0x2a   : > { %s1881_s25 = smov 64   ;;  %s1882_s26 = smov 4  }
  0x2b   : > { %1492 = dma.hbm_to_vmem [thread:$0]  (!%p1989_p11), %s2250_s1, 1024, %s1982_s19, [#allocation6], %s1881_s25, %s1881_s25, %s1882_s26  }
  0x2c   : > { %s1688_s21 = scalar_lea.hbm %s2254_s5, 1024 }
  0x2d   : > { %p1689_p1 = scmp.ne.s32.totalorder %s2254_s5, %s1688_s21  ;;  %p1695_p10 = scmp.lt.u32.totalorder %s1688_s21, %s2254_s5 }
  0x2f   : > { %p1691_p2 = pnand %p1689_p1, %p2005_p13 }
  0x31   : > { %p1692_p6 = pneg %p1691_p2 }
  0x33   : > { %p1697_p3 = pnand %p1695_p10, %p1692_p6 }
  0x35   : > { %1700 = shalt.err (!%p1697_p3)
}
  0x36   : > { %s1701_s19 = scalar_lea.vmem %s1993_s22, 1024  ;;  %p1709_p12 = scmp.lt.s32.totalorder %s1993_s22, %s1993_s22 }
  0x37   : > { %p1702_p5 = scmp.ne.s32.totalorder %s1993_s22, %s1701_s19  ;;  %p1710_p0 = scmp.lt.s32.totalorder %s1701_s19, %s1701_s19 }
  0x39   : > { %p1704_p7 = pnand %p1702_p5, %p2005_p13  ;;  %p1711_p1 = por %p1710_p0, %p1709_p12 }
  0x3b   : > { %p1705_p9 = pneg %p1704_p7 }
  0x3d   : > { %p1712_p2 = pnand %p1711_p1, %p1705_p9 }
  0x3f   : > { %1715 = shalt.err (!%p1712_p2)
}
  0x40   : > { %1498 = dma.hbm_to_vmem [thread:$0]  (!%p1989_p11), %s2254_s5, 1024, %s1993_s22, [#allocation9], %s1881_s25, %s1881_s25, %s1882_s26  }
  0x41   : > { %s1716_s28 = scalar_lea.hbm %s2252_s3, 1024 }
  0x42   : > { %p1717_p6 = scmp.ne.s32.totalorder %s2252_s3, %s1716_s28  ;;  %p1723_p5 = scmp.lt.u32.totalorder %s1716_s28, %s2252_s3 }
  0x44   : > { %p1719_p10 = pnand %p1717_p6, %p2005_p13 }
  0x46   : > { %p1720_p3 = pneg %p1719_p10 }
  0x48   : > { %p1725_p7 = pnand %p1723_p5, %p1720_p3 }
  0x4a   : > { %1728 = shalt.err (!%p1725_p7)
}
  0x4b   : > { %s1729_s19 = scalar_lea.vmem %s281_s24, 1024  ;;  %p1737_p1 = scmp.lt.s32.totalorder %s281_s24, %s281_s24 }
  0x4c   : > { %p1730_p9 = scmp.ne.s32.totalorder %s281_s24, %s1729_s19  ;;  %p1738_p2 = scmp.lt.s32.totalorder %s1729_s19, %s1729_s19 }
  0x4e   : > { %p1732_p12 = pnand %p1730_p9, %p2005_p13  ;;  %p1739_p4 = por %p1738_p2, %p1737_p1 }
  0x50   : > { %p1733_p0 = pneg %p1732_p12 }
  0x52   : > { %p1740_p8 = pnand %p1739_p4, %p1733_p0 }
  0x54   : > { %1743 = shalt.err (!%p1740_p8)
}
  0x55   : > { %1495 = dma.hbm_to_vmem [thread:$0]  (!%p1989_p11), %s2252_s3, 1024, %s281_s24, [#allocation6], %s1881_s25, %s1881_s25, %s1882_s26  }
  0x56   : > { %s1883_s30 = smov [#allocation10]   ;;  %s1744_s29 = scalar_lea.hbm %s2256_s7, 1024 }
  0x57   : > { %s312_s16 = sshll.u32 %s1883_s30, 4  ;;  %p1745_p4 = scmp.ne.s32.totalorder %s2256_s7, %s1744_s29  ;;  %s313_s16 = int_to_ptr.vmem [resolvable:$true] %s312_s16 }
  0x58   : > { %p1751_p10 = scmp.lt.u32.totalorder %s1744_s29, %s2256_s7 }
  0x59   : > { %p1747_p8 = pnand %p1745_p4, %p2005_p13 }
  0x5b   : > { %p1748_p6 = pneg %p1747_p8 }
  0x5d   : > { %p1753_p3 = pnand %p1751_p10, %p1748_p6 }
  0x5f   : > { %1756 = shalt.err (!%p1753_p3)
}
  0x60   : > { %s1757_s24 = scalar_lea.vmem %s313_s16, 1024  ;;  %p1765_p12 = scmp.lt.s32.totalorder %s313_s16, %s313_s16 }
  0x61   : > { %p1758_p5 = scmp.ne.s32.totalorder %s313_s16, %s1757_s24  ;;  %p1766_p0 = scmp.lt.s32.totalorder %s1757_s24, %s1757_s24 }
  0x63   : > { %p1760_p7 = pnand %p1758_p5, %p2005_p13  ;;  %p1767_p1 = por %p1766_p0, %p1765_p12 }
  0x65   : > { %p1761_p9 = pneg %p1760_p7 }
  0x67   : > { %p1768_p2 = pnand %p1767_p1, %p1761_p9 }
  0x69   : > { %1771 = shalt.err (!%p1768_p2)
}
  0x6a   : > { %1501 = dma.hbm_to_vmem [thread:$0]  (!%p1989_p11), %s2256_s7, 1024, %s313_s16, [#allocation9], %s1881_s25, %s1881_s25, %s1882_s26  }
  0x6b   : > { %s2099_s14 = sadd.s32 1, %s1876_s12   ;;  %s34_s20 = sadd.s32 1, %s1872_s11 }
  0x6c   : > { %s31_s30 = ssub.s32 %s1876_s12, %s2099_s14  ;;  %p41_p13 = scmp.ne.s32.totalorder %s1872_s11, %s1868_s10 }
  0x6d   : > { %p32_p4 = scmp.eq.s32.totalorder %s31_s30, 0  ;;  %p42_p8 = scmp.eq.s32.totalorder %s1876_s12, 0 }
  0x6e   : > { %p2273_p6 = scmp.eq.s32.totalorder %s1959_s13, 1  ;;  %p1514_p3 = scmp.lt.s32.totalorder %s1876_s12, 2 }
  0x6f   : > { %s2115_s28 = scalar_select %p32_p4, %s1872_s11, %s34_s20  }
  0x70   : > { %p2109_p10 = por %p2273_p6, %p41_p13  ;;  %p43_p5 = por %p42_p8, %p41_p13 }
  0x71   : > { %s329_s29 = sand.u32 1, %s1872_s11   ;;  %s1323_s16 = sshll.u32 %s1876_s12, 9 }
  0x72   : > { %s1252_s18 = sshll.u32 %s329_s29, 5  ;;  %s2122_s19 = scalar_lea.hbm %s2249_s0, %s1323_s16 }
  0x73   : > { %s333_s24 = scalar_lea.vmem [#allocation2], %s1252_s18  ;;  %p2126_p11 = pnand %p1514_p3, %p43_p5 }
  0x74   : > { %s340_s22 = sshll.u32 %s333_s24, 4  ;;  %s2130_s20 = scalar_lea.sflag [#allocation3], %s329_s29  ;;  %s2124_s22 = int_to_ptr.vmem [resolvable:$true] %s340_s22 }
  0x75   : > { %s1772_s30 = scalar_lea.hbm %s2122_s19, 512  ;;  %p1774_p9 = pneg %p2126_p11 }
  0x76   : > { %p1773_p7 = scmp.ne.s32.totalorder %s2122_s19, %s1772_s30  ;;  %s1777_s21 = scalar_lea.hbm %s2249_s0, 1024 }
  0x77   : > { %p1778_p1 = scmp.lt.u32.totalorder %s2122_s19, %s2249_s0  ;;  %p1779_p2 = scmp.lt.u32.totalorder %s1777_s21, %s1772_s30 }
  0x78   : > { %p1775_p12 = pnand %p1774_p9, %p1773_p7  ;;  %p1781_p4 = scmp.lt.u32.totalorder %s1772_s30, %s2122_s19 }
  0x79   : > { %p1780_p13 = por %p1779_p2, %p1778_p1 }
  0x7a   : > { %p1776_p0 = pneg %p1775_p12 }
  0x7b   : > { %p1782_p8 = por %p1781_p4, %p1780_p13 }
  0x7d   : > { %p1783_p6 = pnand %p1782_p8, %p1776_p0 }
  0x7f   : > { %1786 = shalt.err (!%p1783_p6)
}
  0x80   : > { %s1787_s29 = scalar_lea.vmem %s2124_s22, 512  ;;  %s1884_s18 = smov [#allocation2]  }
  0x81   : > { %p1788_p3 = scmp.ne.s32.totalorder %s2124_s22, %s1787_s29  ;;  %s1792_s16 = sshll.u32 %s1884_s18, 4  ;;  %s1793_s16 = int_to_ptr.vmem [resolvable:$false] %s1792_s16 }
  0x82   : > { %s1794_s23 = scalar_lea.vmem %s1793_s16, 1024  ;;  %p1795_p12 = scmp.lt.s32.totalorder %s2124_s22, %s1793_s16 }
  0x83   : > { %p1790_p5 = pnand %p1788_p3, %p1774_p9  ;;  %p1796_p1 = scmp.lt.s32.totalorder %s1794_s23, %s1787_s29 }
  0x85   : > { %p1791_p7 = pneg %p1790_p5  ;;  %p1797_p2 = por %p1796_p1, %p1795_p12 }
  0x87   : > { %p1798_p13 = pnand %p1797_p2, %p1791_p7 }
  0x89   : > { %1801 = shalt.err (!%p1798_p13)
}
  0x8a   : > { %1505 = dma.hbm_to_vmem [thread:$0]  (!%p2126_p11), %s2122_s19, 512, %s2124_s22, %s2130_s20, %s1881_s25, %s1881_s25, %s1882_s26  }
  0x8b   : > { %p2276_p9 = scmp.ne.s32.totalorder %s2270_s17, 0 }
  0x8c   : > { %s2164_s30 = sand.u32 (!%p2276_p9), 1, %s1868_s10   ;;  %p2277_p0 = scmp.ne.s32.totalorder (!%p2276_p9), %s2267_s15, 0 }
  0x8d   : > { %352 = sbr.rel (%p2276_p9) target bundleno = 1145 (0x479), region = 56  ;;  %s1256_s21 = sshll.u32 (!%p2276_p9), %s2164_s30, 5 }
  0x8e   : > { %s355_s24 = scalar_lea.sflag (!%p2276_p9), [#allocation3], %s2164_s30  ;;  %s2168_s29 = scalar_lea.vmem (!%p2276_p9), [#allocation2], %s1256_s21 }
  0x94   : > { %1847 = dma.done.wait (%p2277_p0), %s355_s24, 512  }
  0x95   : > { %1849 = vsyncadd (%p2277_p0), %s355_s24, 4294966784  ;;  %p2278_p11 = scmp.eq.s32.totalorder %s1959_s13, 0 }
  0x97   : > { %1851 = dma.done.wait (%p2278_p11), [#allocation6], 2048   ;;  %p2279_p4 = pmov %p2278_p11 }
  0x99   : > { %1853 = vsyncadd (%p2279_p4), [#allocation6], 4294965248  ;;  %p2280_p8 = pmov %p2279_p4 }
  0x9a   : > { %p2281_p6 = pmov %p2279_p4 }
  0x9b   : > { %1855 = dma.done.wait (%p2280_p8), [#allocation9], 2048  }
  0x9c   : > { %1857 = vsyncadd (%p2281_p6), [#allocation9], 4294965248  ;;  %v1560_v0 = vld [vmem:[#allocation5] sm:$0xff]   ;;  %v1561_v1 = vld [vmem:[#allocation5 + $0x8] sm:$0xff]   ;;  %s1261_s9 = sshll.u32 %s2164_s30, 6  ;;  %s1324_s21 = sshll.u32 %s1959_s13, 10 }
  0x9d   : > { %1373 = vmatprep.subr.bf16.mxu0 %v1560_v0  ;;  %v1562_v2 = vld [vmem:[#allocation5 + $0x10] sm:$0xff]   ;;  %v1563_v3 = vld [vmem:[#allocation5 + $0x18] sm:$0xff]   ;;  %v1568_v4 = vld [vmem:[%s2168_s29] sm:$0xff]   ;;  %s408_s16 = scalar_lea.vmem [#allocation11], %s1261_s9  ;;  %s2282_s15 = sld [smem:[#allocation18_spill]] }
  0x9e   : > { %1374 = vmatpush3.bf16.msra.mxu0 %v1560_v0  ;;  %1389 = vmatprep.mubr.bf16.mxu0 %v1568_v4  ;;  %v1564_v5 = vld [vmem:[#allocation5 + $0x20] sm:$0xff]   ;;  %v1565_v6 = vld [vmem:[#allocation5 + $0x28] sm:$0xff]   ;;  %v1566_v7 = vld [vmem:[#allocation5 + $0x30] sm:$0xff]   ;;  %s1134_s23 = sshll.u32 %s408_s16, 4  ;;  %s1121_s13 = scalar_lea.sflag [#allocation4], %s2164_s30  ;;  %s2200_s23 = int_to_ptr.vmem [resolvable:$true] %s1134_s23 }
  0x9f   : > { %1375 = vmatprep.subr.bf16.mxu0 %v1561_v1  ;;  %v1567_v8 = vld [vmem:[#allocation5 + $0x38] sm:$0xff]   ;;  %v1569_v9 = vld [vmem:[%s2168_s29 + $0x8] sm:$0xff]   ;;  %v1570_v10 = vld [vmem:[%s2168_s29 + $0x10] sm:$0xff]   ;;  %s1802_s25 = scalar_lea.vmem %s2200_s23, 1024  ;;  %s1885_s26 = smov [#allocation11]  }
  0xa0   : > { %v1571_v11 = vld [vmem:[%s2168_s29 + $0x18] sm:$0xff]   ;;  %v1572_v12 = vld [vmem:[#allocation7] sm:$0xff]   ;;  %v1573_v13 = vld [vmem:[#allocation7 + $0x8] sm:$0xff]   ;;  %p1803_p3 = scmp.ne.s32.totalorder %s2200_s23, %s1802_s25  ;;  %s1806_s19 = sshll.u32 %s1885_s26, 4  ;;  %s1807_s19 = int_to_ptr.vmem [resolvable:$false] %s1806_s19 }
  0xa1   : > { %1397 = vmatprep.subr.bf16.mxu1 %v1572_v12  ;;  %v1574_v14 = vld [vmem:[#allocation7 + $0x10] sm:$0xff]   ;;  %v1575_v15 = vld [vmem:[#allocation7 + $0x18] sm:$0xff]   ;;  %v1576_v16 = vld [vmem:[#allocation7 + $0x20] sm:$0xff]   ;;  %s1808_s22 = scalar_lea.vmem %s1807_s19, 2048  ;;  %p1809_p12 = scmp.lt.s32.totalorder %s2200_s23, %s1807_s19 }
  0xa2   : > { %1376 = vmatpush3.bf16.msra.mxu0 %v1561_v1  ;;  %1398 = vmatpush3.bf16.msra.mxu1 %v1572_v12  ;;  %v1577_v17 = vld [vmem:[#allocation7 + $0x28] sm:$0xff]   ;;  %v1578_v18 = vld [vmem:[#allocation7 + $0x30] sm:$0xff]   ;;  %v1579_v19 = vld [vmem:[#allocation7 + $0x38] sm:$0xff]   ;;  %p1804_p5 = pnand %p1803_p3, %p2109_p10  ;;  %p1810_p1 = scmp.lt.s32.totalorder %s1808_s22, %s1802_s25 }
  0xa3   : > { %1377 = vmatprep.subr.bf16.mxu0 %v1562_v2  ;;  %1399 = vmatprep.subr.bf16.mxu1 %v1573_v13  ;;  %v1580_v20 = vld [vmem:[#allocation8] sm:$0xff]   ;;  %v1581_v21 = vld [vmem:[#allocation8 + $0x8] sm:$0xff]   ;;  %v1582_v22 = vld [vmem:[#allocation8 + $0x10] sm:$0xff]   ;;  %s2205_s17 = scalar_lea.hbm %s2282_s15, %s1324_s21 }
  0xa4   : > { %v1583_v23 = vld [vmem:[#allocation8 + $0x18] sm:$0xff]   ;;  %v1584_v24 = vld [vmem:[#allocation8 + $0x20] sm:$0xff]   ;;  %v1585_v25 = vld [vmem:[#allocation8 + $0x28] sm:$0xff]   ;;  %p1805_p7 = pneg %p1804_p5  ;;  %p1811_p2 = por %p1810_p1, %p1809_p12 }
  0xa5   : > { %v1262_v26 = vld [vmem:[%s2251_s2] ss:$0 sm:$0xff] }
  0xa6   : > { %1378 = vmatpush3.bf16.msra.mxu0 %v1562_v2  ;;  %1400 = vmatpush3.bf16.msra.mxu1 %v1573_v13  ;;  %p1812_p13 = pnand %p1811_p2, %p1805_p7 }
  0xa7   : > { %1379 = vmatprep.subr.bf16.mxu0 %v1563_v3  ;;  %1401 = vmatprep.subr.bf16.mxu1 %v1574_v14 }
  0xaa   : > { %1380 = vmatpush3.bf16.msra.mxu0 %v1563_v3  ;;  %1402 = vmatpush3.bf16.msra.mxu1 %v1574_v14 }
  0xab   : > { %1381 = vmatprep.subr.bf16.mxu0 %v1564_v5  ;;  %1403 = vmatprep.subr.bf16.mxu1 %v1575_v15 }
  0xae   : > { %1382 = vmatpush3.bf16.msra.mxu0 %v1564_v5  ;;  %1404 = vmatpush3.bf16.msra.mxu1 %v1575_v15 }
  0xaf   : > { %1383 = vmatprep.subr.bf16.mxu0 %v1565_v6  ;;  %1405 = vmatprep.subr.bf16.mxu1 %v1576_v16 }
  0xb2   : > { %1384 = vmatpush3.bf16.msra.mxu0 %v1565_v6  ;;  %1406 = vmatpush3.bf16.msra.mxu1 %v1576_v16 }
  0xb3   : > { %1385 = vmatprep.subr.bf16.mxu0 %v1566_v7  ;;  %1407 = vmatprep.subr.bf16.mxu1 %v1577_v17 }
  0xb6   : > { %1386 = vmatpush3.bf16.msra.mxu0 %v1566_v7  ;;  %1408 = vmatpush3.bf16.msra.mxu1 %v1577_v17 }
  0xb7   : > { %1387 = vmatprep.subr.bf16.mxu0 %v1567_v8  ;;  %1409 = vmatprep.subr.bf16.mxu1 %v1578_v18 }
  0xba   : > { %1388 = vmatpush3.bf16.msra.mxu0 %v1567_v8  ;;  %1410 = vmatpush3.bf16.msra.mxu1 %v1578_v18 }
  0xbb   : > { %1411 = vmatprep.subr.bf16.mxu1 %v1579_v19  ;;  %1421 = vmatprep.subr.bf16.mxu0 %v1580_v20 }
  0xbd   : > { %1390 = vmatmul.mubr.bf16.vlgmr.msra.gmra.mrb[0].mxu0 %v1569_v9 }
  0xbe   : > { %1393 = vmatprep.mubr.bf16.mxu0 %v1570_v10  ;;  %1412 = vmatpush3.bf16.msra.mxu1 %v1579_v19 }
  0xbf   : > { %1422 = vmatpush3.bf16.msra.mxu0 %v1580_v20 }
  0xc0   : > { %1423 = vmatprep.subr.bf16.mxu0 %v1581_v21 }
  0xc3   : > { %1424 = vmatpush3.bf16.msra.mxu0 %v1581_v21 }
  0xc4   : > { %1425 = vmatprep.subr.bf16.mxu0 %v1582_v22 }
  0xc5   : > { %1394 = vmatmul.mubr.bf16.gmra.mrb[4].mxu0 %v1571_v11 }
  0xc7   : > { %1426 = vmatpush3.bf16.msra.mxu0 %v1582_v22 }
  0xc8   : > { %1427 = vmatprep.subr.bf16.mxu0 %v1583_v23 }
  0xcb   : > { %1428 = vmatpush3.bf16.msra.mxu0 %v1583_v23  ;;  %v1586_v23 = vld [vmem:[#allocation8 + $0x30] sm:$0xff]  }
  0xcc   : > { %1429 = vmatprep.subr.bf16.mxu0 %v1584_v24 }
  0xcf   : > { %1430 = vmatpush3.bf16.msra.mxu0 %v1584_v24  ;;  %v1587_v24 = vld [vmem:[#allocation8 + $0x38] sm:$0xff]  }
  0xd0   : > { %1431 = vmatprep.subr.bf16.mxu0 %v1585_v25 }
  0xd3   : > { %1432 = vmatpush3.bf16.msra.mxu0 %v1585_v25 }
  0xd4   : > { %1433 = vmatprep.subr.bf16.mxu0 %v1586_v23 }
  0xd7   : > { %1434 = vmatpush3.bf16.msra.mxu0 %v1586_v23 }
  0xd8   : > { %1435 = vmatprep.subr.bf16.mxu0 %v1587_v24 }
  0xdb   : > { %1436 = vmatpush3.bf16.msra.mxu0 %v1587_v24 }
 0x190   : > { %v1391_v27 = vpop.f32.mrb[0].mxu0 }
 0x191   : > { %v558_v28 = vadd.f32 %v1391_v27, %v1262_v26  ;;  %v549_v29 = vpop.f32.mrb[1].mxu0 }
 0x192   : > { %v550_v30 = vadd.f32 %v1262_v26, %v549_v29  ;;  %v1392_v31 = vpop.f32.mrb[2].mxu0 }
 0x193   : > { %v1277_v32 = vmul.f32 -1.442695, %v558_v28  ;;  %v561_v33 = vadd.f32 %v1392_v31, %v1262_v26  ;;  %v552_v34 = vpop.f32.mrb[3].mxu0 }
 0x194   : > { %v1275_v35 = vmul.f32 -1.442695, %v550_v30  ;;  %v553_v36 = vadd.f32 %v1262_v26, %v552_v34 }
 0x195   : > { %1596 = vpow2.f32 %v1277_v32  ;;  %v1278_v37 = vmul.f32 -1.442695, %v561_v33 }
 0x196   : > { %1598 = vpow2.f32 %v1275_v35  ;;  %v1276_v38 = vmul.f32 -1.442695, %v553_v36 }
 0x197   : > { %1600 = vpow2.f32 %v1278_v37 }
 0x198   : > { %1602 = vpow2.f32 %v1276_v38  ;;  %v1395_v39 = vpop.f32.mrb[4].mxu0 }
 0x199   : > { %v574_v40 = vadd.f32 %v1395_v39, %v1262_v26  ;;  %v565_v41 = vpop.f32.mrb[5].mxu0 }
 0x19a   : > { %v566_v42 = vadd.f32 %v1262_v26, %v565_v41  ;;  %v1396_v43 = vpop.f32.mrb[6].mxu0 }
 0x19b   : > { %v1281_v44 = vmul.f32 -1.442695, %v574_v40  ;;  %v577_v45 = vadd.f32 %v1396_v43, %v1262_v26  ;;  %v568_v46 = vpop.f32.mrb[7].mxu0 }
 0x19c   : > { %v1279_v47 = vmul.f32 -1.442695, %v566_v42  ;;  %v569_v48 = vadd.f32 %v1262_v26, %v568_v46  ;;  %v1283_v26 = vld [vmem:[%s2253_s4] ss:$0 sm:$0xff] }
 0x19d   : > { %1604 = vpow2.f32 %v1281_v44  ;;  %v1282_v49 = vmul.f32 -1.442695, %v577_v45  ;;  %v1588_v46 = vld [vmem:[#allocation10] sm:$0xff]  }
 0x19e   : > { %1606 = vpow2.f32 %v1279_v47  ;;  %v1280_v50 = vmul.f32 -1.442695, %v569_v48  ;;  %1445 = vmatprep.subr.bf16.mxu1 %v1588_v46  ;;  %v1589_v47 = vld [vmem:[#allocation10 + $0x8] sm:$0xff]  }
 0x19f   : > { %v1597_v51 = vpop.eup %1596  ;;  %1608 = vpow2.f32 %v1282_v49  ;;  %v1591_v49 = vld [vmem:[#allocation10 + $0x18] sm:$0xff]  }
 0x1a0   : > { %v1599_v52 = vpop.eup %1598  ;;  %v606_v53 = vadd.f32 1.0, %v1597_v51  ;;  %1610 = vpow2.f32 %v1280_v50  ;;  %v1592_v50 = vld [vmem:[#allocation10 + $0x20] sm:$0xff]   ;;  %v1593_v51 = vld [vmem:[#allocation10 + $0x28] sm:$0xff]  }
 0x1a1   : > { %v1601_v54 = vpop.eup %1600  ;;  %v604_v55 = vadd.f32 1.0, %v1599_v52  ;;  %v1594_v52 = vld [vmem:[#allocation10 + $0x30] sm:$0xff]  }
 0x1a2   : > { %v1603_v56 = vpop.eup %1602  ;;  %1612 = vrcp.f32 %v606_v53  ;;  %v607_v57 = vadd.f32 1.0, %v1601_v54  ;;  %v1595_v53 = vld [vmem:[#allocation10 + $0x38] sm:$0xff]   ;;  %v1292_v54 = vld [vmem:[%s2255_s6] ss:$0 sm:$0xff] }
 0x1a3   : > { %1614 = vrcp.f32 %v604_v55  ;;  %v605_v58 = vadd.f32 1.0, %v1603_v56 }
 0x1a4   : > { %1616 = vrcp.f32 %v607_v57 }
 0x1a5   : > { %1618 = vrcp.f32 %v605_v58 }
 0x1a7   : > { %v1605_v59 = vpop.eup %1604 }
 0x1a8   : > { %v1607_v60 = vpop.eup %1606  ;;  %v610_v61 = vadd.f32 1.0, %v1605_v59 }
 0x1a9   : > { %v1609_v62 = vpop.eup %1608  ;;  %v608_v63 = vadd.f32 1.0, %v1607_v60 }
 0x1aa   : > { %v1611_v0 = vpop.eup %1610  ;;  %1620 = vrcp.f32 %v610_v61  ;;  %v611_v1 = vadd.f32 1.0, %v1609_v62 }
 0x1ab   : > { %1622 = vrcp.f32 %v608_v63  ;;  %v609_v2 = vadd.f32 1.0, %v1611_v0 }
 0x1ac   : > { %v1613_v3 = vpop.eup %1612  ;;  %1624 = vrcp.f32 %v611_v1 }
 0x1ad   : > { %v1615_v4 = vpop.eup %1614  ;;  %1626 = vrcp.f32 %v609_v2  ;;  %v630_v7 = vmul.f32 %v1613_v3, %v558_v28 }
 0x1ae   : > { %v1617_v5 = vpop.eup %1616  ;;  %v628_v9 = vmul.f32 %v1615_v4, %v550_v30 }
 0x1af   : > { %v1619_v6 = vpop.eup %1618  ;;  %v631_v8 = vmul.f32 %v1617_v5, %v561_v33 }
 0x1b0   : > { %v629_v10 = vmul.f32 %v1619_v6, %v553_v36 }
 0x1b1   : > { %v637_v11 = vpack.c.bf16 %v631_v8, %v630_v7 }
 0x1b2   : > { %v636_v12 = vpack.c.bf16 %v629_v10, %v628_v9 }
 0x1b4   : > { %v1621_v13 = vpop.eup %1620  ;;  %1413 = vmatprep.mubr.bf16.mxu1 %v636_v12 }
 0x1b5   : > { %v1623_v14 = vpop.eup %1622  ;;  %1414 = vmatmul.mubr.bf16.vlgmr.msra.gmra.mrb[0].mxu1 %v637_v11  ;;  %v634_v17 = vmul.f32 %v1621_v13, %v574_v40 }
 0x1b6   : > { %v1625_v15 = vpop.eup %1624  ;;  %v632_v19 = vmul.f32 %v1623_v14, %v566_v42  ;;  %1446 = vmatpush3.bf16.msra.mxu1 %v1588_v46 }
 0x1b7   : > { %v1627_v16 = vpop.eup %1626  ;;  %v635_v18 = vmul.f32 %v1625_v15, %v577_v45  ;;  %1447 = vmatprep.subr.bf16.mxu1 %v1589_v47 }
 0x1b8   : > { %v633_v20 = vmul.f32 %v1627_v16, %v569_v48  ;;  %v1590_v48 = vld [vmem:[#allocation10 + $0x10] sm:$0xff]  }
 0x1b9   : > { %v639_v21 = vpack.c.bf16 %v635_v18, %v634_v17 }
 0x1ba   : > { %v638_v22 = vpack.c.bf16 %v633_v20, %v632_v19  ;;  %1448 = vmatpush3.bf16.msra.mxu1 %v1589_v47 }
 0x1bb   : > { %1449 = vmatprep.subr.bf16.mxu1 %v1590_v48 }
 0x1bc   : > { %1417 = vmatprep.mubr.bf16.mxu1 %v638_v22 }
 0x1bd   : > { %1418 = vmatmul.mubr.bf16.gmra.mrb[4].mxu1 %v639_v21 }
 0x1be   : > { %1450 = vmatpush3.bf16.msra.mxu1 %v1590_v48 }
 0x1bf   : > { %1451 = vmatprep.subr.bf16.mxu1 %v1591_v49 }
 0x1c2   : > { %1452 = vmatpush3.bf16.msra.mxu1 %v1591_v49 }
 0x1c3   : > { %1453 = vmatprep.subr.bf16.mxu1 %v1592_v50 }
 0x1c6   : > { %1454 = vmatpush3.bf16.msra.mxu1 %v1592_v50 }
 0x1c7   : > { %1455 = vmatprep.subr.bf16.mxu1 %v1593_v51 }
 0x1ca   : > { %1456 = vmatpush3.bf16.msra.mxu1 %v1593_v51  ;;  %v1309_v51 = vld [vmem:[%s2257_s8] ss:$0 sm:$0xff] }
 0x1cb   : > { %1457 = vmatprep.subr.bf16.mxu1 %v1594_v52 }
 0x1ce   : > { %1458 = vmatpush3.bf16.msra.mxu1 %v1594_v52 }
 0x1cf   : > { %1459 = vmatprep.subr.bf16.mxu1 %v1595_v53 }
 0x1d2   : > { %1460 = vmatpush3.bf16.msra.mxu1 %v1595_v53 }
 0x288   : > { %v1415_v25 = vpop.f32.mrb[0].mxu1 }
 0x289   : > { %v745_v27 = vpop.f32.mrb[1].mxu1  ;;  %v754_v29 = vadd.f32 %v1415_v25, %v1283_v26 }
 0x28a   : > { %v1416_v28 = vpop.f32.mrb[2].mxu1  ;;  %v746_v32 = vadd.f32 %v1283_v26, %v745_v27 }
 0x28b   : > { %v757_v30 = vadd.f32 %v1416_v28, %v1283_v26  ;;  %v748_v31 = vpop.f32.mrb[3].mxu1 }
 0x28c   : > { %v749_v33 = vadd.f32 %v1283_v26, %v748_v31 }
 0x28d   : > { %v777_v34 = vpack.c.bf16 %v757_v30, %v754_v29 }
 0x28e   : > { %v776_v35 = vpack.c.bf16 %v749_v33, %v746_v32 }
 0x290   : > { %v1419_v36 = vpop.f32.mrb[4].mxu1  ;;  %1437 = vmatprep.mubr.bf16.mxu0 %v776_v35 }
 0x291   : > { %v761_v37 = vpop.f32.mrb[5].mxu1  ;;  %1438 = vmatmul.mubr.bf16.vlgmr.msra.gmra.mrb[8].mxu0 %v777_v34  ;;  %v770_v39 = vadd.f32 %v1419_v36, %v1283_v26 }
 0x292   : > { %v1420_v38 = vpop.f32.mrb[6].mxu1  ;;  %v762_v42 = vadd.f32 %v1283_v26, %v761_v37 }
 0x293   : > { %v773_v40 = vadd.f32 %v1420_v38, %v1283_v26  ;;  %v764_v41 = vpop.f32.mrb[7].mxu1 }
 0x294   : > { %v765_v43 = vadd.f32 %v1283_v26, %v764_v41 }
 0x295   : > { %v779_v44 = vpack.c.bf16 %v773_v40, %v770_v39 }
 0x296   : > { %v778_v45 = vpack.c.bf16 %v765_v43, %v762_v42 }
 0x298   : > { %1441 = vmatprep.mubr.bf16.mxu0 %v778_v45 }
 0x299   : > { %1442 = vmatmul.mubr.bf16.gmra.mrb[12].mxu0 %v779_v44 }
 0x364   : > { %v1439_v55 = vpop.f32.mrb[8].mxu0 }
 0x365   : > { %v894_v56 = vadd.f32 %v1439_v55, %v1292_v54  ;;  %v885_v57 = vpop.f32.mrb[9].mxu0 }
 0x366   : > { %v886_v58 = vadd.f32 %v1292_v54, %v885_v57  ;;  %v1440_v59 = vpop.f32.mrb[10].mxu0 }
 0x367   : > { %v1303_v60 = vmul.f32 -1.442695, %v894_v56  ;;  %v897_v61 = vadd.f32 %v1440_v59, %v1292_v54  ;;  %v888_v62 = vpop.f32.mrb[11].mxu0 }
 0x368   : > { %v1301_v63 = vmul.f32 -1.442695, %v886_v58  ;;  %v889_v0 = vadd.f32 %v1292_v54, %v888_v62 }
 0x369   : > { %1628 = vpow2.f32 %v1303_v60  ;;  %v1304_v1 = vmul.f32 -1.442695, %v897_v61 }
 0x36a   : > { %1630 = vpow2.f32 %v1301_v63  ;;  %v1302_v2 = vmul.f32 -1.442695, %v889_v0 }
 0x36b   : > { %1632 = vpow2.f32 %v1304_v1 }
 0x36c   : > { %1634 = vpow2.f32 %v1302_v2  ;;  %v1443_v3 = vpop.f32.mrb[12].mxu0 }
 0x36d   : > { %v910_v4 = vadd.f32 %v1443_v3, %v1292_v54  ;;  %v901_v5 = vpop.f32.mrb[13].mxu0 }
 0x36e   : > { %v902_v6 = vadd.f32 %v1292_v54, %v901_v5  ;;  %v1444_v7 = vpop.f32.mrb[14].mxu0 }
 0x36f   : > { %v1307_v8 = vmul.f32 -1.442695, %v910_v4  ;;  %v913_v9 = vadd.f32 %v1444_v7, %v1292_v54  ;;  %v904_v10 = vpop.f32.mrb[15].mxu0 }
 0x370   : > { %v1305_v11 = vmul.f32 -1.442695, %v902_v6  ;;  %v905_v12 = vadd.f32 %v1292_v54, %v904_v10 }
 0x371   : > { %1636 = vpow2.f32 %v1307_v8  ;;  %v1308_v13 = vmul.f32 -1.442695, %v913_v9 }
 0x372   : > { %1638 = vpow2.f32 %v1305_v11  ;;  %v1306_v14 = vmul.f32 -1.442695, %v905_v12 }
 0x373   : > { %v1629_v15 = vpop.eup %1628  ;;  %1640 = vpow2.f32 %v1308_v13 }
 0x374   : > { %v1631_v16 = vpop.eup %1630  ;;  %v942_v17 = vadd.f32 1.0, %v1629_v15  ;;  %1642 = vpow2.f32 %v1306_v14 }
 0x375   : > { %v1633_v18 = vpop.eup %1632  ;;  %v940_v19 = vadd.f32 1.0, %v1631_v16 }
 0x376   : > { %v1635_v20 = vpop.eup %1634  ;;  %1644 = vrcp.f32 %v942_v17  ;;  %v943_v21 = vadd.f32 1.0, %v1633_v18 }
 0x377   : > { %1646 = vrcp.f32 %v940_v19  ;;  %v941_v22 = vadd.f32 1.0, %v1635_v20 }
 0x378   : > { %1648 = vrcp.f32 %v943_v21 }
 0x379   : > { %1650 = vrcp.f32 %v941_v22 }
 0x37b   : > { %v1637_v23 = vpop.eup %1636 }
 0x37c   : > { %v1639_v24 = vpop.eup %1638  ;;  %v946_v25 = vadd.f32 1.0, %v1637_v23 }
 0x37d   : > { %v1641_v26 = vpop.eup %1640  ;;  %v944_v27 = vadd.f32 1.0, %v1639_v24 }
 0x37e   : > { %v1643_v28 = vpop.eup %1642  ;;  %1652 = vrcp.f32 %v946_v25  ;;  %v947_v29 = vadd.f32 1.0, %v1641_v26 }
 0x37f   : > { %1654 = vrcp.f32 %v944_v27  ;;  %v945_v30 = vadd.f32 1.0, %v1643_v28 }
 0x380   : > { %v1645_v31 = vpop.eup %1644  ;;  %1656 = vrcp.f32 %v947_v29 }
 0x381   : > { %v1647_v32 = vpop.eup %1646  ;;  %1658 = vrcp.f32 %v945_v30  ;;  %v966_v35 = vmul.f32 %v1645_v31, %v894_v56 }
 0x382   : > { %v1649_v33 = vpop.eup %1648  ;;  %v964_v37 = vmul.f32 %v1647_v32, %v886_v58 }
 0x383   : > { %v1651_v34 = vpop.eup %1650  ;;  %v967_v36 = vmul.f32 %v1649_v33, %v897_v61 }
 0x384   : > { %v965_v38 = vmul.f32 %v1651_v34, %v889_v0 }
 0x385   : > { %v973_v39 = vpack.c.bf16 %v967_v36, %v966_v35 }
 0x386   : > { %v972_v40 = vpack.c.bf16 %v965_v38, %v964_v37 }
 0x388   : > { %v1653_v41 = vpop.eup %1652  ;;  %1461 = vmatprep.mubr.bf16.mxu1 %v972_v40 }
 0x389   : > { %v1655_v42 = vpop.eup %1654  ;;  %1462 = vmatmul.mubr.bf16.vlgmr.msra.gmra.mrb[8].mxu1 %v973_v39  ;;  %v970_v45 = vmul.f32 %v1653_v41, %v910_v4 }
 0x38a   : > { %v1657_v43 = vpop.eup %1656  ;;  %v968_v47 = vmul.f32 %v1655_v42, %v902_v6 }
 0x38b   : > { %v1659_v44 = vpop.eup %1658  ;;  %v971_v46 = vmul.f32 %v1657_v43, %v913_v9 }
 0x38c   : > { %v969_v48 = vmul.f32 %v1659_v44, %v905_v12 }
 0x38d   : > { %v975_v49 = vpack.c.bf16 %v971_v46, %v970_v45 }
 0x38e   : > { %v974_v50 = vpack.c.bf16 %v969_v48, %v968_v47 }
 0x390   : > { %1465 = vmatprep.mubr.bf16.mxu1 %v974_v50 }
 0x391   : > { %1466 = vmatmul.mubr.bf16.gmra.mrb[12].mxu1 %v975_v49 }
 0x45c   : > { %v1463_v52 = vpop.f32.mrb[8].mxu1 }
 0x45d   : > { %v1090_v53 = vadd.f32 %v1463_v52, %v1309_v51  ;;  %v1081_v54 = vpop.f32.mrb[9].mxu1 }
 0x45e   : > { %v1082_v55 = vadd.f32 %v1309_v51, %v1081_v54  ;;  %v1464_v56 = vpop.f32.mrb[10].mxu1 }
 0x45f   : > { %1114 = vst [vmem:[%s408_s16 + $0x10] sm:$0xff] %v1090_v53  ;;  %v1093_v57 = vadd.f32 %v1464_v56, %v1309_v51  ;;  %v1084_v58 = vpop.f32.mrb[11].mxu1 }
 0x460   : > { %1112 = vst [vmem:[%s408_s16] sm:$0xff] %v1082_v55  ;;  %v1085_v59 = vadd.f32 %v1309_v51, %v1084_v58 }
 0x461   : > { %1115 = vst [vmem:[%s408_s16 + $0x18] sm:$0xff] %v1093_v57 }
 0x462   : > { %1113 = vst [vmem:[%s408_s16 + $0x8] sm:$0xff] %v1085_v59 }
 0x464   : > { %v1467_v60 = vpop.f32.mrb[12].mxu1 }
 0x465   : > { %v1106_v61 = vadd.f32 %v1467_v60, %v1309_v51  ;;  %v1097_v62 = vpop.f32.mrb[13].mxu1 }
 0x466   : > { %v1098_v63 = vadd.f32 %v1309_v51, %v1097_v62  ;;  %v1468_v0 = vpop.f32.mrb[14].mxu1 }
 0x467   : > { %1118 = vst [vmem:[%s408_s16 + $0x30] sm:$0xff] %v1106_v61  ;;  %v1109_v1 = vadd.f32 %v1468_v0, %v1309_v51  ;;  %v1100_v2 = vpop.f32.mrb[15].mxu1 }
 0x468   : > { %1116 = vst [vmem:[%s408_s16 + $0x20] sm:$0xff] %v1098_v63  ;;  %v1101_v3 = vadd.f32 %v1309_v51, %v1100_v2 }
 0x469   : > { %1119 = vst [vmem:[%s408_s16 + $0x38] sm:$0xff] %v1109_v1 }
 0x46a   : > { %1117 = vst [vmem:[%s408_s16 + $0x28] sm:$0xff] %v1101_v3 }
 0x46b   : > { %1815 = shalt.err (!%p1812_p13)
}
 0x46c   : > { %s1816_s9 = scalar_lea.hbm %s2205_s17, 1024  ;;  %s1820_s16 = scalar_lea.hbm %s2282_s15, 2048 }
 0x46d   : > { %p1817_p9 = scmp.ne.s32.totalorder %s2205_s17, %s1816_s9  ;;  %p1821_p4 = scmp.lt.u32.totalorder %s2205_s17, %s2282_s15 }
 0x46e   : > { %p1822_p8 = scmp.lt.u32.totalorder %s1820_s16, %s1816_s9  ;;  %p1824_p3 = scmp.lt.u32.totalorder %s1816_s9, %s2205_s17 }
 0x46f   : > { %p1818_p0 = pnand %p1817_p9, %p2109_p10 }
 0x470   : > { %p1823_p6 = por %p1822_p8, %p1821_p4 }
 0x471   : > { %p1819_p11 = pneg %p1818_p0 }
 0x472   : > { %p1825_p5 = por %p1824_p3, %p1823_p6 }
 0x474   : > { %p1826_p7 = pnand %p1825_p5, %p1819_p11 }
 0x476   : > { %1829 = shalt.err (!%p1826_p7)
}
 0x477   : > { %s1886_s29 = smov 128   ;;  %s1887_s25 = smov 8  }
 0x478   : > { %1487 = dma.vmem_to_hbm [thread:$0]  (%p2109_p10), %s2200_s23, 1024, %s2205_s17, %s1121_s13, %s1886_s29, %s1886_s29, %s1887_s25  }
 0x479 PF: > { %s2283_s26 = sld [smem:[#allocation16_spill]]  ;;  %s2284_s19 = sld [smem:[#allocation17_spill]] }
 0x47a   : > { %p2286_p1 = scmp.ge.s32.totalorder %s1876_s12, 2 }
 0x47f   : > { %s1149_s22 = sand.u32 1, %s2283_s26   ;;  %p2285_p12 = scmp.ne.s32.totalorder %s2284_s19, 0 }
 0x480   : > { %s1150_s9 = scalar_lea.sflag [#allocation4], %s1149_s22 }
 0x481   : > { %p1507_p2 = pnand %p2286_p1, %p2285_p12 }
 0x483   : > { %1859 = dma.done.wait (!%p1507_p2), %s1150_s9, 1024  }
 0x484   : > { %1861 = vsyncadd (!%p1507_p2), %s1150_s9, 4294966272  ;;  %p24_p13 = scmp.ge.s32.totalorder %s2099_s14, 4   ;;  %s2287_s30 = smov %s1868_s10 }
 0x485   : > { %s2288_s10 = smov %s1872_s11  ;;  %s2289_s11 = smov %s2115_s28 }
 0x486   : > { %s2290_s12 = smov %s2099_s14  ;;  %26 = sbr.rel (!%p24_p13) target bundleno = 9 (0x9), region = 117 }
 0x48d   :  { %1155 = vsyncpa [#allocation3], 1 }
 0x48e   :  { %1157 = vsyncpa [#allocation3 + $0x1], 1 }
 0x48f   :  { %1158 = vsyncpa [#allocation6], 1 }
 0x490   :  { %1159 = vsyncpa [#allocation9], 1 }
 0x491   :  { %1160 = vsyncpa [#allocation4], 1 }
 0x492   :  { %1162 = vsyncpa [#allocation4 + $0x1], 1 }

</bundles_post_ra>
